<compile_context>
chip_gen: v5e
topology: v5e:2x2
jax: 0.10.0
libtpu: 0.0.40
codegen_flags: <defaults>
</compile_context>

<pallas_src>
import jax
import jax.numpy as jnp
from jax.experimental import pallas as pl
from jax.experimental.pallas import tpu as pltpu


# ----------------------------------------------------------------------------
# Kernel: per-tile 1x1 conv as an unrolled VPU multiply-add with SMEM scalars
# ----------------------------------------------------------------------------
def _fully_conv_kernel(w_ref, b_ref, x_ref, o_ref):
    # w_ref: SMEM (C,) f32    b_ref: SMEM (1,) f32
    # x_ref: VMEM (Bblk, C, HW_TILE) in the input dtype
    # o_ref: VMEM (Bblk, HW_TILE)
    C = x_ref.shape[1]
    # Bias folded into the accumulator init; accumulate in f32.
    acc = jnp.full(o_ref.shape, b_ref[0], dtype=jnp.float32)
    for c in range(C):  # static unroll (C is small); each step is one lane-dense VPU FMA
        acc = acc + x_ref[:, c, :] * w_ref[c]
    o_ref[...] = acc.astype(o_ref.dtype)


def fully_conv_layer(x, weight, bias):
    """1x1 Conv2d: x (B, C, H, W), weight (1, C, 1, 1), bias (1,) -> (B, 1, H, W)."""
    B, C, H, W = x.shape
    HW = H * W
    itemsize = jnp.dtype(x.dtype).itemsize

    # ---- tile selection ----------------------------------------------------
    # Batch block: full B when small (sublane dim = full extent), else a
    # multiple of 8 so the (Bblk, HW_TILE) output block stays sublane-dense.
    if B <= 8 or B % 8 != 0:
        b_block = B
    else:
        b_block = 8

    # HW tile: lane-dense (multiple of 128) and as fat as a modest VMEM budget
    # allows; full extent when HW is not a multiple of 128.
    if HW % 128 == 0:
        hw_tile = min(HW, 2048)
        while HW % hw_tile != 0:
            hw_tile -= 128
        # Keep double-buffered input block comfortably inside VMEM (all gens).
        max_block_bytes = 8 * 1024 * 1024
        while (b_block * C * hw_tile * itemsize > max_block_bytes
               and hw_tile % 256 == 0):
            hw_tile //= 2
    else:
        hw_tile = HW

    grid = (B // b_block, HW // hw_tile)

    # ---- operands ----------------------------------------------------------
    w_s = weight.reshape(C).astype(jnp.float32)   # (C,)  -> SMEM scalars
    b_s = bias.reshape(1).astype(jnp.float32)     # (1,)  -> SMEM scalar
    x2 = x.reshape(B, C, HW)                      # contiguous view, free

    cost = pl.CostEstimate(
        flops=2 * B * C * HW,
        transcendentals=0,
        bytes_accessed=(B * C * HW + B * HW) * itemsize + (C + 1) * 4,
    )

    y = pl.pallas_call(
        _fully_conv_kernel,
        out_shape=jax.ShapeDtypeStruct((B, HW), x.dtype),
        grid=grid,
        in_specs=[
            pl.BlockSpec(memory_space=pltpu.MemorySpace.SMEM),            # weight
            pl.BlockSpec(memory_space=pltpu.MemorySpace.SMEM),            # bias
            pl.BlockSpec((b_block, C, hw_tile), lambda bi, hi: (bi, 0, hi)),
        ],
        out_specs=pl.BlockSpec((b_block, hw_tile), lambda bi, hi: (bi, hi)),
        compiler_params=pltpu.CompilerParams(
            dimension_semantics=("parallel", "parallel")),
        cost_estimate=cost,
    )(w_s, b_s, x2)

    return y.reshape(B, 1, H, W)


# ----------------------------------------------------------------------------
# Pure-JAX reference (matches PyTorch nn.Conv2d(c, 1, 1) forward)
# ----------------------------------------------------------------------------
def _reference(x, weight, bias):
    # out[b, 0, h, w] = sum_c weight[0, c, 0, 0] * x[b, c, h, w] + bias[0]
    w = weight.reshape(1, -1)                     # (1, C)
    return jnp.einsum("oc,bchw->bohw", w, x) + bias.reshape(1, 1, 1, 1)


if __name__ == "__main__":
    # Small shapes consistent with the module: batch=2, channels=4, spatial=16x16.
    B, C, H, W = 2, 4, 16, 16

    key = jax.random.PRNGKey(0)
    kx, kw, kb = jax.random.split(key, 3)
    x = jax.random.normal(kx, (B, C, H, W), jnp.float32)
    weight = 0.2 * jax.random.normal(kw, (1, C, 1, 1), jnp.float32)
    bias = 0.1 * jax.random.normal(kb, (1,), jnp.float32)

    out = jax.block_until_ready(fully_conv_layer(x, weight, bias))

    ref = _reference(x, weight, bias)
    assert out.shape == (B, 1, H, W), out.shape
    assert bool(jnp.all(jnp.isfinite(out)))
    assert bool(jnp.allclose(out, ref, atol=1e-5, rtol=1e-5))
    print("KERNEL_OK")
</pallas_src>

<mosaic_0001>
module attributes {stable_mosaic.version = 11 : i64} {
  func.func @_fully_conv_kernel(%arg0: i32, %arg1: i32, %arg2: memref<4xf32, #tpu.memory_space<smem>>, %arg3: memref<1xf32, #tpu.memory_space<smem>>, %arg4: memref<2x4x256xf32, #tpu.memory_space<vmem>>, %arg5: memref<2x256xf32, #tpu.memory_space<vmem>>) attributes {dimension_semantics = [#tpu.dimension_semantics<parallel>, #tpu.dimension_semantics<parallel>], iteration_bounds = array<i64: 1, 1>, scalar_prefetch = 0 : i64, scratch_operands = 0 : i64, tpu.core_type = #tpu.core_type<tc>, window_params = [{transform_indices = @transform_0, window_bounds = array<i64: 4>}, {transform_indices = @transform_1, window_bounds = array<i64: 1>}, {transform_indices = @transform_2, window_bounds = array<i64: 2, 4, 256>}, {transform_indices = @transform_3, window_bounds = array<i64: 2, 256>}]} {
    %c0 = arith.constant 0 : index
    %0 = memref.load %arg3[%c0] : memref<1xf32, #tpu.memory_space<smem>>
    %1 = vector.broadcast %0 : f32 to vector<2x256xf32>
    %c0_0 = arith.constant 0 : index
    %c0_1 = arith.constant 0 : index
    %c0_2 = arith.constant 0 : index
    %2 = vector.load %arg4[%c0_0, %c0_1, %c0_2] : memref<2x4x256xf32, #tpu.memory_space<vmem>>, vector<2x1x256xf32>
    %3 = vector.shape_cast %2 : vector<2x1x256xf32> to vector<2x256xf32>
    %c0_3 = arith.constant 0 : index
    %4 = memref.load %arg2[%c0_3] : memref<4xf32, #tpu.memory_space<smem>>
    %5 = vector.broadcast %4 : f32 to vector<2x256xf32>
    %6 = arith.mulf %3, %5 : vector<2x256xf32>
    %7 = arith.addf %1, %6 : vector<2x256xf32>
    %c0_4 = arith.constant 0 : index
    %c1 = arith.constant 1 : index
    %c0_5 = arith.constant 0 : index
    %8 = vector.load %arg4[%c0_4, %c1, %c0_5] : memref<2x4x256xf32, #tpu.memory_space<vmem>>, vector<2x1x256xf32>
    %9 = vector.shape_cast %8 : vector<2x1x256xf32> to vector<2x256xf32>
    %c1_6 = arith.constant 1 : index
    %10 = memref.load %arg2[%c1_6] : memref<4xf32, #tpu.memory_space<smem>>
    %11 = vector.broadcast %10 : f32 to vector<2x256xf32>
    %12 = arith.mulf %9, %11 : vector<2x256xf32>
    %13 = arith.addf %7, %12 : vector<2x256xf32>
    %c0_7 = arith.constant 0 : index
    %c2 = arith.constant 2 : index
    %c0_8 = arith.constant 0 : index
    %14 = vector.load %arg4[%c0_7, %c2, %c0_8] : memref<2x4x256xf32, #tpu.memory_space<vmem>>, vector<2x1x256xf32>
    %15 = vector.shape_cast %14 : vector<2x1x256xf32> to vector<2x256xf32>
    %c2_9 = arith.constant 2 : index
    %16 = memref.load %arg2[%c2_9] : memref<4xf32, #tpu.memory_space<smem>>
    %17 = vector.broadcast %16 : f32 to vector<2x256xf32>
    %18 = arith.mulf %15, %17 : vector<2x256xf32>
    %19 = arith.addf %13, %18 : vector<2x256xf32>
    %c0_10 = arith.constant 0 : index
    %c3 = arith.constant 3 : index
    %c0_11 = arith.constant 0 : index
    %20 = vector.load %arg4[%c0_10, %c3, %c0_11] : memref<2x4x256xf32, #tpu.memory_space<vmem>>, vector<2x1x256xf32>
    %21 = vector.shape_cast %20 : vector<2x1x256xf32> to vector<2x256xf32>
    %c3_12 = arith.constant 3 : index
    %22 = memref.load %arg2[%c3_12] : memref<4xf32, #tpu.memory_space<smem>>
    %23 = vector.broadcast %22 : f32 to vector<2x256xf32>
    %24 = arith.mulf %21, %23 : vector<2x256xf32>
    %25 = arith.addf %19, %24 : vector<2x256xf32>
    %c0_13 = arith.constant 0 : index
    %c0_14 = arith.constant 0 : index
    %26 = vector.load %arg5[%c0_13, %c0_14] : memref<2x256xf32, #tpu.memory_space<vmem>>, vector<2x256xf32>
    tpu.vector_store %arg5[%c0_13, %c0_14], %25 {strides = array<i32>} : memref<2x256xf32, #tpu.memory_space<vmem>>, vector<2x256xf32>,
    return
  }
  func.func @transform_0(%arg0: i32, %arg1: i32) -> i32 {
    %c0_i32 = arith.constant 0 : i32
    %c0_i32_0 = arith.constant 0 : i32
    return %c0_i32 : i32
  }
  func.func @transform_1(%arg0: i32, %arg1: i32) -> i32 {
    %c0_i32 = arith.constant 0 : i32
    %c0_i32_0 = arith.constant 0 : i32
    return %c0_i32 : i32
  }
  func.func @transform_2(%arg0: i32, %arg1: i32) -> (i32, i32, i32) {
    %c0_i32 = arith.constant 0 : i32
    %c0_i32_0 = arith.constant 0 : i32
    return %arg0, %c0_i32, %arg1 : i32, i32, i32
  }
  func.func @transform_3(%arg0: i32, %arg1: i32) -> (i32, i32) {
    %c0_i32 = arith.constant 0 : i32
    return %arg0, %arg1 : i32, i32
  }
}

</mosaic_0001>

<bundles_post_ra>
// kernel: tpu_custom_call.1
= control target key start
LH: loop header
LB: loop body
LE: loop exit
PB: predicated region body
PF: predicated region fallthrough
CT: control target
= control target key end

     0   :  { %9 = vsyncpa [#allocation6], 0  ;;  %s223_s0 = inlined_call_operand.vmem [shape: f32[4], index: 0, kind: input, shape index: {}]   ;;  %s224_s1 = inlined_call_operand.<no memory space> [shape: f32[1], index: 1, kind: input, shape index: {}]   ;;  %s225_s2 = inlined_call_operand.hbm [shape: f32[2,4,256], index: 2, kind: input, shape index: {}]   ;;  %s226_s3 = inlined_call_operand.hbm [shape: f32[2,256], index: 3, kind: output, shape index: {}]  }
   0x1   :  { %10 = vsyncpa [#allocation4], 0 }
   0x2   :  { %11 = vsyncpa [#allocation5], 0  ;;  %s17_s14 = sshll.u32 %s223_s0, 4  ;;  %s27_s17 = sshll.u32 %s225_s2, 4  ;;  %s18_s14 = int_to_ptr.vmem [resolvable:$true] %s17_s14  ;;  %s28_s17 = int_to_ptr.hbm [resolvable:$true] %s27_s17 }
   0x3   :  { %s186_s18 = smov [#allocation3]   ;;  %s187_s19 = smov [#allocation7]  }
   0x4   :  { %20 = dma.vmem_to_smem %s18_s14, 16, %s186_s18, [#allocation6]  }
   0x5   :  { %s29_s20 = sshll.u32 %s187_s19, 4  ;;  %s188_s21 = smov 128   ;;  %s30_s20 = int_to_ptr.vmem [resolvable:$true] %s29_s20 }
   0x6   :  { %s189_s22 = smov 8  }
   0x7   :  { %35 = dma.hbm_to_vmem [thread:$0]  %s28_s17, 256, %s30_s20, [#allocation4], %s188_s21, %s188_s21, %s189_s22  }
   0x8   :  { %180 = dma.done.wait [#allocation6], 16  }
   0x9   :  { %181 = vsyncadd [#allocation6], 4294967280 }
   0xa   :  { %182 = dma.done.wait [#allocation4], 256  }
   0xb   :  { %183 = vsyncadd [#allocation4], 4294967040 }
   0xc   :  { %44 = sfence }
   0xd   :  { %s50_s0 = sld [smem:[#allocation3]]  ;;  %v47_v0 = vld [vmem:[#allocation7] ss:$4 sm:$0x3]  ;;  %v46_v4 = vstv %s224_s1  ;;  %s190_s1 = smov [#allocation8]  }
   0xe   :  { %s112_s23 = sld [smem:[#allocation3 + $0x1]]  ;;  %v49_v1 = vld [vmem:[#allocation7 + $0x8] ss:$4 sm:$0x3]  ;;  %s99_s27 = sshll.u32 %s190_s1, 4  ;;  %s100_s27 = int_to_ptr.vmem [resolvable:$true] %s99_s27 }
   0xf   :  { %s113_s24 = sld [smem:[#allocation3 + $0x2]]  ;;  %v57_v2 = vld [vmem:[#allocation7 + $0x1] ss:$4 sm:$0x3]  ;;  %s101_s30 = sshll.u32 %s226_s3, 4  ;;  %s102_s30 = int_to_ptr.hbm [resolvable:$true] %s101_s30 }
  0x10   :  { %s114_s25 = sld [smem:[#allocation3 + $0x3]]  ;;  %v59_v3 = vld [vmem:[#allocation7 + $0x9] ss:$4 sm:$0x3] }
  0x11   :  { %v67_v6 = vld [vmem:[#allocation7 + $0x2] ss:$4 sm:$0x3]  ;;  %v69_v10 = vld [vmem:[#allocation7 + $0xa] ss:$4 sm:$0x3] }
  0x12   :  { %v77_v13 = vld [vmem:[#allocation7 + $0x3] ss:$4 sm:$0x3]  ;;  %v79_v15 = vld [vmem:[#allocation7 + $0xb] ss:$4 sm:$0x3] }
  0x13   :  { %v51_v5 = vstv %s50_s0 }
  0x14   :  { %v52_v7 = vmul.f32 %v51_v5, %v47_v0  ;;  %v61_v8 = vstv %s112_s23  ;;  %v53_v9 = vmul.f32 %v51_v5, %v49_v1 }
  0x15   :  { %v62_v11 = vmul.f32 %v61_v8, %v57_v2  ;;  %v71_v12 = vstv %s113_s24  ;;  %v63_v14 = vmul.f32 %v61_v8, %v59_v3 }
  0x16   :  { %v54_v16 = vadd.f32 %v52_v7, %v46_v4  ;;  %v72_v17 = vmul.f32 %v71_v12, %v67_v6  ;;  %v81_v18 = vstv %s114_s25  ;;  %v55_v19 = vadd.f32 %v53_v9, %v46_v4 }
  0x17   :  { %v73_v20 = vmul.f32 %v71_v12, %v69_v10  ;;  %v82_v22 = vmul.f32 %v81_v18, %v77_v13  ;;  %v83_v24 = vmul.f32 %v81_v18, %v79_v15 }
  0x18   :  { %v64_v21 = vadd.f32 %v62_v11, %v54_v16  ;;  %v65_v23 = vadd.f32 %v63_v14, %v55_v19 }
  0x1a   :  { %v74_v25 = vadd.f32 %v72_v17, %v64_v21  ;;  %v75_v26 = vadd.f32 %v73_v20, %v65_v23 }
  0x1c   :  { %v84_v27 = vadd.f32 %v82_v22, %v74_v25  ;;  %v85_v28 = vadd.f32 %v83_v24, %v75_v26 }
  0x1e   :  { %88 = vst [vmem:[#allocation1] ss:$2 sm:$0xff] %v84_v27 }
  0x1f   :  { %90 = vst [vmem:[#allocation1 + $0x1] ss:$2 sm:$0xff] %v85_v28 }
  0x26   :  { %v91_v29 = vld [vmem:[#allocation1] sm:$0xff] }
  0x27   :  { %93 = vst [vmem:[#allocation8] sm:$0xf] %v91_v29 }
  0x28   :  { %104 = dma.vmem_to_hbm [thread:$0]  %s100_s27, 64, %s102_s30, [#allocation5]  }
  0x29   :  { %184 = dma.done.wait [#allocation5], 64  }
  0x2a   :  { %185 = vsyncadd [#allocation5], 4294967232 }
  0x2b   :  { %109 = vsyncpa [#allocation4], 1 }
  0x2c   :  { %110 = vsyncpa [#allocation5], 1 }
  0x2d   :  { %111 = vsyncpa [#allocation6], 1 }

</bundles_post_ra>
